<compile_context>
chip_gen: v6e
topology: v6e:2x2x1
jax: 0.10.0
libtpu: 0.0.40
codegen_flags: <defaults>
</compile_context>

<pallas_src>
import functools

import jax
import jax.numpy as jnp
from jax.experimental import pallas as pl
from jax.experimental.pallas import tpu as pltpu

HIDDEN = 32


def _round_up(x: int, m: int) -> int:
    return ((x + m - 1) // m) * m


def value_mlp_kernel(xT_ref, w1T_ref, b1_ref, w2_ref, b2_ref, o_ref):
    # xT_ref : (D, TB)  VMEM   lane-dense state tile (batch on lanes), pipelined
    # w1T_ref: (H, D)   VMEM   resident across grid steps
    # b1_ref : (H, 1)   VMEM   resident
    # w2_ref : (1, H)   VMEM   resident (second-layer weight as a row)
    # b2_ref : (1,)     SMEM   scalar
    # o_ref  : (1, TB)  VMEM   lane-dense output row
    hT = jnp.dot(w1T_ref[...], xT_ref[...], preferred_element_type=jnp.float32)
    hT = jnp.maximum(hT + b1_ref[...], 0.0)                     # ReLU, (H, TB) f32
    out = jnp.dot(w2_ref[...], hT, preferred_element_type=jnp.float32)  # (1, TB)
    o_ref[...] = (out + b2_ref[0]).astype(o_ref.dtype)


@functools.partial(jax.jit, static_argnames=("block_b",))
def value_approximator_forward(state, w1, b1, w2, b2, *, block_b=32768):
    """Fused Linear(D->32) -> ReLU -> Linear(32->1). Returns (B, 1) float32.

    state: (B, D), w1: (D, 32), b1: (32,), w2: (32, 1), b2: (1,)
    (w1/w2 are the pre-transposed PyTorch Linear weights, i.e. x @ w1 layout.)
    """
    B, D = state.shape
    H = w1.shape[1]

    # Batch tile = lane axis of every block.
    if B <= 256:
        # Single full-extent block: block shapes equal the array dims, so the
        # (8, 128) rule is trivially satisfied and there is no masking at all.
        tb = B
    else:
        # At least 2 grid steps (keeps both v7x TensorCores fed); tile is a
        # multiple of 128 lanes so all blocks except the ragged tail are
        # unmasked, lane-dense loads/stores.  The ragged tail is masked by
        # Pallas automatically -- no wrapper-side jnp.pad copy.
        tb = min(_round_up(block_b, 128), _round_up(pl.cdiv(B, 2), 128))
    n_tiles = pl.cdiv(B, tb)

    # Lane-dense layouts: batch on the last (lane) axis everywhere.
    xT = state.T                                    # (D, B); keep producer dtype
    w1T = w1.T.astype(jnp.float32)                  # (H, D)
    b1_col = b1.reshape(H, 1).astype(jnp.float32)   # broadcasts over (H, TB)
    w2_row = w2.reshape(1, H).astype(jnp.float32)   # (32,1) column -> (1,32) row
    b2_smem = b2.reshape(1).astype(jnp.float32)     # scalar in SMEM

    out_row = pl.pallas_call(
        value_mlp_kernel,
        out_shape=jax.ShapeDtypeStruct((1, B), jnp.float32),
        grid=(n_tiles,),
        in_specs=[
            pl.BlockSpec((D, tb), lambda i: (0, i)),            # state tiles
            pl.BlockSpec((H, D), lambda i: (0, 0)),             # w1T resident
            pl.BlockSpec((H, 1), lambda i: (0, 0)),             # b1 resident
            pl.BlockSpec((1, H), lambda i: (0, 0)),             # w2 row resident
            pl.BlockSpec(memory_space=pltpu.MemorySpace.SMEM),  # b2 scalar
        ],
        out_specs=pl.BlockSpec((1, tb), lambda i: (0, i)),      # lane-dense out
        compiler_params=pltpu.CompilerParams(
            dimension_semantics=("parallel",),          # v7x: split over 2 TCs
            vmem_limit_bytes=32 * 1024 * 1024,          # fits v5e/v6e/v7x
        ),
        cost_estimate=pl.CostEstimate(
            flops=2 * B * D * H + 2 * B * H,
            transcendentals=0,
            bytes_accessed=(state.dtype.itemsize * B * D
                            + 4 * (D * H + 2 * H + 1 + B)),
        ),
    )(xT, w1T, b1_col, w2_row, b2_smem)

    return out_row.reshape(B, 1)


def init_params(key, input_shape, hidden=HIDDEN):
    """Deterministic init mirroring nn.Linear default (uniform +-1/sqrt(fan_in))."""
    k1, k2, k3, k4 = jax.random.split(key, 4)
    bound1 = 1.0 / jnp.sqrt(input_shape)
    bound2 = 1.0 / jnp.sqrt(hidden)
    w1 = jax.random.uniform(k1, (input_shape, hidden), jnp.float32, -bound1, bound1)
    b1 = jax.random.uniform(k2, (hidden,), jnp.float32, -bound1, bound1)
    w2 = jax.random.uniform(k3, (hidden, 1), jnp.float32, -bound2, bound2)
    b2 = jax.random.uniform(k4, (1,), jnp.float32, -bound2, bound2)
    return w1, b1, w2, b2


if __name__ == "__main__":
    key = jax.random.PRNGKey(0)
    k_params, k1, k2, k3 = jax.random.split(key, 4)

    input_shape = 4   # CartPole-style 4-dim observation
    w1, b1, w2, b2 = init_params(k_params, input_shape, HIDDEN)

    def reference(x):
        return jnp.maximum(x @ w1 + b1, 0.0) @ w2 + b2

    # 1) Tiny batch (typical rollout usage): single full-extent block.
    s_small = jax.random.normal(k1, (2, input_shape), jnp.float32)
    o_small = jax.block_until_ready(
        value_approximator_forward(s_small, w1, b1, w2, b2))
    assert o_small.shape == (2, 1)
    assert jnp.allclose(o_small, reference(s_small), atol=1e-5, rtol=1e-5)

    # 2) Multi-step grid with a 128-lane-aligned ragged tail: B=384 -> 256+128.
    s_mid = jax.random.normal(k2, (384, input_shape), jnp.float32)
    o_mid = jax.block_until_ready(
        value_approximator_forward(s_mid, w1, b1, w2, b2))
    assert o_mid.shape == (384, 1)
    assert jnp.allclose(o_mid, reference(s_mid), atol=1e-5, rtol=1e-5)

    # 3) Masked tail that is NOT a multiple of 128 lanes: B=1000 -> 512+488.
    s_odd = jax.random.normal(k3, (1000, input_shape), jnp.float32)
    o_odd = jax.block_until_ready(
        value_approximator_forward(s_odd, w1, b1, w2, b2))
    assert o_odd.shape == (1000, 1)
    assert jnp.allclose(o_odd, reference(s_odd), atol=1e-5, rtol=1e-5)

    print("KERNEL_OK")
</pallas_src>

<mosaic_0001>
module attributes {stable_mosaic.version = 11 : i64} {
  func.func @value_mlp_kernel(%arg0: i32, %arg1: memref<4x2xf32, #tpu.memory_space<vmem>>, %arg2: memref<32x4xf32, #tpu.memory_space<vmem>>, %arg3: memref<32x1xf32, #tpu.memory_space<vmem>>, %arg4: memref<1x32xf32, #tpu.memory_space<vmem>>, %arg5: memref<1xf32, #tpu.memory_space<smem>>, %arg6: memref<1x2xf32, #tpu.memory_space<vmem>>) attributes {dimension_semantics = [#tpu.dimension_semantics<parallel>], iteration_bounds = array<i64: 1>, scalar_prefetch = 0 : i64, scratch_operands = 0 : i64, tpu.core_type = #tpu.core_type<tc>, window_params = [{transform_indices = @transform_0, window_bounds = array<i64: 4, 2>}, {pipeline_mode = #tpu.pipeline_mode<synchronous>, transform_indices = @transform_1, window_bounds = array<i64: 32, 4>}, {pipeline_mode = #tpu.pipeline_mode<synchronous>, transform_indices = @transform_2, window_bounds = array<i64: 32, 1>}, {pipeline_mode = #tpu.pipeline_mode<synchronous>, transform_indices = @transform_3, window_bounds = array<i64: 1, 32>}, {transform_indices = @transform_4, window_bounds = array<i64: 1>}, {transform_indices = @transform_5, window_bounds = array<i64: 1, 2>}]} {
    %c0 = arith.constant 0 : index
    %c0_0 = arith.constant 0 : index
    %0 = vector.load %arg2[%c0, %c0_0] : memref<32x4xf32, #tpu.memory_space<vmem>>, vector<32x4xf32>
    %c0_1 = arith.constant 0 : index
    %c0_2 = arith.constant 0 : index
    %1 = vector.load %arg1[%c0_1, %c0_2] : memref<4x2xf32, #tpu.memory_space<vmem>>, vector<4x2xf32>
    %cst = arith.constant dense<0.000000e+00> : vector<32x2xf32>
    %2 = tpu.matmul %0, %1, %cst {dimension_numbers = #tpu.dot_dimension_numbers<[1], [0], [0], [1], [0, 0, 1, 1], [], []>} : vector<32x4xf32>, vector<4x2xf32>, vector<32x2xf32> -> vector<32x2xf32>
    %c0_3 = arith.constant 0 : index
    %c0_4 = arith.constant 0 : index
    %3 = vector.load %arg3[%c0_3, %c0_4] : memref<32x1xf32, #tpu.memory_space<vmem>>, vector<32x1xf32>
    %4 = vector.broadcast %3 : vector<32x1xf32> to vector<32x2xf32>
    %5 = arith.addf %2, %4 : vector<32x2xf32>
    %cst_5 = arith.constant 0.000000e+00 : f32
    %6 = vector.broadcast %cst_5 : f32 to vector<32x2xf32>
    %7 = arith.maximumf %5, %6 : vector<32x2xf32>
    %c0_6 = arith.constant 0 : index
    %c0_7 = arith.constant 0 : index
    %8 = vector.load %arg4[%c0_6, %c0_7] : memref<1x32xf32, #tpu.memory_space<vmem>>, vector<1x32xf32>
    %cst_8 = arith.constant dense<0.000000e+00> : vector<1x2xf32>
    %9 = tpu.matmul %8, %7, %cst_8 {dimension_numbers = #tpu.dot_dimension_numbers<[1], [0], [0], [1], [0, 0, 1, 1], [], []>} : vector<1x32xf32>, vector<32x2xf32>, vector<1x2xf32> -> vector<1x2xf32>
    %c0_9 = arith.constant 0 : index
    %10 = memref.load %arg5[%c0_9] : memref<1xf32, #tpu.memory_space<smem>>
    %11 = vector.broadcast %10 : f32 to vector<1x2xf32>
    %12 = arith.addf %9, %11 : vector<1x2xf32>
    %c0_10 = arith.constant 0 : index
    %c0_11 = arith.constant 0 : index
    %13 = vector.load %arg6[%c0_10, %c0_11] : memref<1x2xf32, #tpu.memory_space<vmem>>, vector<1x2xf32>
    tpu.vector_store %arg6[%c0_10, %c0_11], %12 {strides = array<i32>} : memref<1x2xf32, #tpu.memory_space<vmem>>, vector<1x2xf32>,
    return
  }
  func.func @transform_0(%arg0: i32) -> (i32, i32) {
    %c0_i32 = arith.constant 0 : i32
    %c0_i32_0 = arith.constant 0 : i32
    return %c0_i32, %arg0 : i32, i32
  }
  func.func @transform_1(%arg0: i32) -> (i32, i32) {
    %c0_i32 = arith.constant 0 : i32
    %c0_i32_0 = arith.constant 0 : i32
    %c0_i32_1 = arith.constant 0 : i32
    return %c0_i32, %c0_i32_0 : i32, i32
  }
  func.func @transform_2(%arg0: i32) -> (i32, i32) {
    %c0_i32 = arith.constant 0 : i32
    %c0_i32_0 = arith.constant 0 : i32
    %c0_i32_1 = arith.constant 0 : i32
    return %c0_i32, %c0_i32_0 : i32, i32
  }
  func.func @transform_3(%arg0: i32) -> (i32, i32) {
    %c0_i32 = arith.constant 0 : i32
    %c0_i32_0 = arith.constant 0 : i32
    %c0_i32_1 = arith.constant 0 : i32
    return %c0_i32, %c0_i32_0 : i32, i32
  }
  func.func @transform_4(%arg0: i32) -> i32 {
    %c0_i32 = arith.constant 0 : i32
    %c0_i32_0 = arith.constant 0 : i32
    return %c0_i32 : i32
  }
  func.func @transform_5(%arg0: i32) -> (i32, i32) {
    %c0_i32 = arith.constant 0 : i32
    %c0_i32_0 = arith.constant 0 : i32
    return %c0_i32, %arg0 : i32, i32
  }
}

</mosaic_0001>

<bundles_post_ra>
// kernel: value_approximator_forward.1
= control target key start
LH: loop header
LB: loop body
LE: loop exit
PB: predicated region body
PF: predicated region fallthrough
CT: control target
= control target key end

     0   :  { %vm64_vm0 = vcmask 1043456   ;;  %vm51_vm1 = vcmask 31744   ;;  %v313_v5 = vmov 0   ;;  %s387_s0 = inlined_call_operand.vmem [shape: f32[4,2], index: 0, kind: input, shape index: {}]   ;;  %s388_s1 = inlined_call_operand.vmem [shape: f32[32,4], index: 1, kind: input, shape index: {}]   ;;  %s389_s2 = inlined_call_operand.vmem [shape: f32[32,1], index: 2, kind: input, shape index: {}]   ;;  %s390_s3 = inlined_call_operand.vmem [shape: f32[1,32], index: 3, kind: input, shape index: {}]   ;;  %s391_s4 = inlined_call_operand.<no memory space> [shape: f32[1], index: 4, kind: input, shape index: {}]   ;;  %s392_s5 = inlined_call_operand.hbm [shape: f32[1,2], index: 5, kind: output, shape index: {}]  }
   0x1   :  { %v26_v0 = vld [vmem:[%s387_s0] sm:$0xf]  ;;  %v23_v2 = vld [vmem:[%s388_s1 + $0x8] sm:$0xff]  ;;  %v24_v3 = vld [vmem:[%s388_s1 + $0x10] sm:$0xff]  ;;  %290 = vset.pattern.permute.xlu1 %v313_v5  ;;  %289 = vset.pattern.permute.xlu0 %v313_v5 }
   0x2   :  { %v22_v1 = vld [vmem:[%s388_s1] sm:$0xff]  ;;  %266 = vmatprep.subr.msk.mxu0 %vm64_vm0, %v26_v0  ;;  %v30_v4 = vld [vmem:[%s389_s2 + $0x18] sm:$0xff]  ;;  %v28_v6 = vld [vmem:[%s389_s2 + $0x8] sm:$0xff] }
   0x3   :  { %268 = vmatprep.mubr.msk.f32.mxu0 %vm51_vm1, %v22_v1  ;;  %267 = vmatpush3.msk.msra.mxu0 %vm64_vm0, %v26_v0 }
   0x4   :  { %269 = vmatmul.mubr.msk.f32.vlgmr.msra.gmra.mxu0 %vm51_vm1, %v23_v2 }
   0x5   :  { %11 = vsyncpa [#allocation4], 0  ;;  %271 = vmatprep.mubr.msk.f32.mxu0 %vm51_vm1, %v24_v3  ;;  %v25_v7 = vld [vmem:[%s388_s1 + $0x18] sm:$0xff]  ;;  %48 = vperm.xlu0 %289, %v30_v4   ;;  %v29_v8 = vld [vmem:[%s389_s2 + $0x10] sm:$0xff]  ;;  %v314_v10 = vmov 0.0   ;;  %vm315_vm2 = vmmov 0   ;;  %v159_v28 = vstv %s391_s4 }
   0x6   :  { %38 = vperm.xlu1 %290, %v28_v6   ;;  %v27_v9 = vld [vmem:[%s389_s2] sm:$0xff]  ;;  %274 = vmatprep.subr.mxu1 %v314_v10  ;;  %vm160_vm3 = vcmask 261120   ;;  %s316_s12 = smov [#allocation3]   ;;  %vm234_vm4 = vcmask 8192  }
   0x7   :  { %282 = vmatprep.mubr.msk.f32.mxu1 %vm315_vm2, %v314_v10  ;;  %v157_v27 = vld [vmem:[%s390_s3] sm:$0x1]  ;;  %s242_s13 = sshll.u32 %s316_s12, 4  ;;  %s243_s13 = int_to_ptr.vmem [resolvable:$true] %s242_s13 }
   0x8   :  { %272 = vmatmul.mubr.msk.f32.gmra.mxu0 %vm51_vm1, %v25_v7  ;;  %s291_s14 = scalar_lea.vmem %s243_s13, 16  ;;  %s295_s15 = scalar_lea.vmem %s243_s13, 32 }
   0x9   :  { %43 = vperm.xlu0 %289, %v29_v8   ;;  %p292_p0 = scmp.ne.s32.totalorder %s243_s13, %s291_s14  ;;  %p296_p1 = scmp.lt.s32.totalorder %s243_s13, %s243_s13 }
   0xa   :  { %33 = vperm.xlu1 %290, %v27_v9   ;;  %p297_p2 = scmp.lt.s32.totalorder %s295_s15, %s291_s14 }
   0xc   :  { %p298_p3 = por %p297_p2, %p296_p1 }
   0xe   :  { %p299_p4 = pnand %p298_p3, %p292_p0 }
  0x80   :  { %v49_v11 = vpop.permute.xlu0 %48 }
  0x81   :  { %v39_v12 = vpop.permute.xlu1 %38 }
  0x84   :  { %v44_v16 = vpop.permute.xlu0 %43 }
  0x85   :  { %v34_v18 = vpop.permute.xlu1 %33 }
  0xc4   :  { %v270_v13 = vpop.f32.mrf.mxu0 }
  0xc5   :  { %v140_v20 = vadd.f32 %v270_v13, %v39_v12 }
  0xc6   :  { %v134_v14 = vpop.f32.mrf.mxu0 }
  0xc7   :  { %v135_v23 = vadd.f32 %v134_v14, %v34_v18  ;;  %v154_v25 = vmax.f32 %v140_v20, 0.0 }
  0xc8   :  { %v273_v15 = vpop.f32.mrf.mxu0 }
  0xc9   :  { %v150_v17 = vadd.f32 %v273_v15, %v49_v11  ;;  %v153_v26 = vmax.f32 %v135_v23, 0.0 }
  0xca   :  { %v144_v19 = vpop.f32.mrf.mxu0 }
  0xcb   :  { %v156_v21 = vmax.f32 %v150_v17, 0.0  ;;  %v145_v22 = vadd.f32 %v144_v19, %v44_v16 }
  0xcd   :  { %v155_v24 = vmax.f32 %v145_v22, 0.0  ;;  %275 = vmatpush3.msra.mxu1 %v156_v21 }
  0xce   :  { %276 = vmatprep.subr.mxu1 %v314_v10 }
  0xcf   :  { %277 = vmatpush3.msra.mxu1 %v155_v24 }
  0xd0   :  { %278 = vmatprep.subr.mxu1 %v314_v10 }
  0xd1   :  { %279 = vmatpush3.msra.mxu1 %v154_v25 }
  0xd2   :  { %280 = vmatprep.subr.mxu1 %v314_v10 }
  0xd3   :  { %281 = vmatpush3.msra.mxu1 %v153_v26 }
  0xd4   :  { %283 = vmatmul.mubr.msk.f32.vlgmr.msra.gmra.mxu1 %vm160_vm3, %v157_v27 }
 0x194   :  { %v230_v29 = vpop.f32.mrf.mxu1 }
 0x195   :  { %v231_v30 = vadd.f32 %v230_v29, %v159_v28 }
 0x196   :  { %v284_v31 = vpop.f32.mrf.mxu1 }
 0x197   :  { %235 = vst.msk [vmem:[#allocation3] sm:$0x1] %vm234_vm4, %v231_v30 }
 0x198   :  { %302 = shalt.err (!%p299_p4)
}
 0x199   :  { %245 = dma.vmem_to_hbm [thread:$0]  %s243_s13, 16, %s392_s5, [#allocation4]  }
 0x19a   :  { %311 = dma.done.wait [#allocation4], 16  }
 0x19b   :  { %312 = vsyncadd [#allocation4], 4294967280 }
 0x19c   :  { %249 = vsyncpa [#allocation4], 1 }

</bundles_post_ra>
